<compile_context>
chip_gen: v7x
topology: tpu7x:2x2x1
jax: 0.10.0
libtpu: 0.0.40
codegen_flags: <defaults>
</compile_context>

<pallas_src>
import jax
import jax.numpy as jnp
from jax import lax
from jax.experimental import pallas as pl
from jax.experimental.pallas import tpu as pltpu

D_WORD = 768
NEG_INF = -1e30          # same constant convention as the usual masked_softmax util
LANE = 128
CHUNK = 8                # batches folded into one inner matmul / softmax slab


def _round_up(x, m):
    return (x + m - 1) // m * m


def _vmem_capacity_bytes():
    try:
        cap = int(getattr(pltpu.get_tpu_info(), "vmem_capacity_bytes", 0))
    except Exception:
        cap = 0
    # Fall back to the most conservative figure (v7x: 64 MiB per TensorCore).
    return cap if cap > 0 else 64 * 1024 * 1024


def _plan_blocks(B, Lc, itemsize):
    """Generation-aware batch-block sizing for the HBM-bound qa-head stream."""
    Lc_pad = _round_up(Lc, LANE)
    per_batch_bytes = Lc_pad * D_WORD * itemsize
    vmem_cap = _vmem_capacity_bytes()
    # Multi-MiB hidden-state blocks: at >= ~8 MiB the fixed ~0.35 us/step
    # pipeline overhead is <5% of the DMA time on every generation, while the
    # double-buffered block stays well inside VMEM (128 MiB on v5e/v6e, 64 MiB
    # per TensorCore on v7x).
    target_block_bytes = min(12 << 20, vmem_cap // 6)
    bb = max(1, int(target_block_bytes // per_batch_bytes))
    if B >= 2:
        # Keep >= 2 grid steps so dimension_semantics=("parallel",) can spread
        # the batch axis across both v7x TensorCores.
        bb = min(bb, (B + 1) // 2)
    bb = min(bb, B)
    if bb > CHUNK:
        bb = (bb // CHUNK) * CHUNK           # inner loop needs bb % CHUNK == 0
    B_pad = _round_up(B, bb)
    return Lc_pad, bb, B_pad, vmem_cap


def qa_head_kernel(h_ref, idx_ref, w_ref, b_ref, out_ref):
    """Fused qa_outputs Linear(768->2) + masked log-softmax over the context.

    h_ref:   (bb, Lc, D)  context hidden states (bf16 storage, f32 accumulation)
    idx_ref: (bb, 1, Lc)  int32 context token ids (mask = ids != 0)
    w_ref:   (2, D)       qa_outputs weight, nn.Linear [out, in] layout
    b_ref:   (2, 1)       f32 qa_outputs bias
    out_ref: (bb, 2, Lc)  f32; [:, 0, :] start log-probs, [:, 1, :] end log-probs
    """
    bb, _, d = h_ref.shape
    cb = min(CHUNK, bb)              # wrapper guarantees bb % cb == 0
    n_chunks = bb // cb

    # Hoisted out of the loop: JAX does not CSE broadcast_in_dim.
    wb = jnp.broadcast_to(w_ref[...], (cb, 2, d))      # tiny, bf16
    bias = b_ref[...]                                  # (2, 1) f32

    def chunk_body(c, carry):
        s = c * cb
        h = h_ref[pl.ds(s, cb)]                        # (cb, Lc, D) bf16
        ids = idx_ref[pl.ds(s, cb)]                    # (cb, 1, Lc) int32
        # One batched MXU contraction over D per chunk, f32 accumulation:
        #   (cb, 2, D) x (cb, Lc, D) -> (cb, 2, Lc)
        logits = jnp.einsum("bod,bld->bol", wb, h,
                            preferred_element_type=jnp.float32) + bias
        masked = jnp.where(ids != 0, logits, NEG_INF)  # pad / 0-id tokens -> -inf
        # Log-softmax over the lane axis (the 128-padded context length).
        # Padded lanes contribute exp(NEG_INF - finite) == 0 as long as the row
        # has at least one real token; a fully-masked row (degenerate all-pad
        # context or batch padding, which is sliced away) just yields ~0s.
        mx = jnp.max(masked, axis=-1, keepdims=True)
        lse = jnp.log(jnp.sum(jnp.exp(masked - mx), axis=-1, keepdims=True)) + mx
        out_ref[pl.ds(s, cb)] = masked - lse           # lane-dense store
        return carry

    lax.fori_loop(0, n_chunks, chunk_body, 0, unroll=True)


def qa_head(context_h, cw_idxs, qa_w, qa_b, *, block_batch=None):
    """Masked start/end log-softmax over the context sequence.

    Streams the [B, Lc, 768] hidden states once from HBM (bf16), gridded over
    multi-MiB batch blocks; matmul, mask and log-softmax are fused in-kernel.
    """
    B, Lc, D = context_h.shape
    itemsize = context_h.dtype.itemsize
    Lc_pad, bb, B_pad, vmem_cap = _plan_blocks(B, Lc, itemsize)

    if block_batch is not None:
        bb = max(1, int(block_batch))
        if bb > CHUNK:
            bb = (bb // CHUNK) * CHUNK
        bb = min(bb, B)
        B_pad = _round_up(B, bb)
    elif B_pad != B:
        # Padding the batch axis would copy the whole feature tensor through
        # HBM; prefer a (>= half-sized) block that divides B instead.
        for cand in range(bb - 1, 0, -1):
            if (B % cand == 0 and (cand <= CHUNK or cand % CHUNK == 0)
                    and 2 * cand >= bb):
                bb, B_pad = cand, B
                break

    # Lane-dense padding of the sequence axis; padded ids are 0 -> masked out.
    if Lc_pad != Lc:
        context_h = jnp.pad(context_h, ((0, 0), (0, Lc_pad - Lc), (0, 0)))
        cw_idxs = jnp.pad(cw_idxs, ((0, 0), (0, Lc_pad - Lc)))
    if B_pad != B:
        context_h = jnp.pad(context_h, ((0, B_pad - B), (0, 0), (0, 0)))
        cw_idxs = jnp.pad(cw_idxs, ((0, B_pad - B), (0, 0)))

    idx3 = cw_idxs.astype(jnp.int32).reshape(B_pad, 1, Lc_pad)
    w = qa_w.astype(context_h.dtype)                 # bf16 weights, f32 MXU accum
    b2 = qa_b.astype(jnp.float32).reshape(2, 1)

    # Double-buffered pipeline footprint + slack; raise the scoped-VMEM limit
    # explicitly (v5e's default is only 16 MiB) but stay well under the physical
    # capacity of the smallest generation (v7x: 64 MiB per TensorCore).
    hid_blk = bb * Lc_pad * D * itemsize
    idx_blk = bb * Lc_pad * 4
    out_blk = bb * 2 * Lc_pad * 4
    small = 2 * D * itemsize + 2 * 4
    vmem_need = 2 * (hid_blk + idx_blk + out_blk + small) + (4 << 20)
    vmem_limit = int(min(max(vmem_need, 32 << 20), int(0.9 * vmem_cap)))

    cost = pl.CostEstimate(
        flops=4 * B_pad * Lc_pad * D,                # 2 out-features, 2 flops/MAC
        transcendentals=3 * B_pad * Lc_pad,          # exp (start/end rows) + log
        bytes_accessed=(B_pad * Lc_pad * D * itemsize    # dominant bf16 stream
                        + B_pad * Lc_pad * 4             # int32 ids
                        + B_pad * 2 * Lc_pad * 4         # f32 log-probs
                        + small))

    out = pl.pallas_call(
        qa_head_kernel,
        out_shape=jax.ShapeDtypeStruct((B_pad, 2, Lc_pad), jnp.float32),
        grid=(B_pad // bb,),
        in_specs=[
            pl.BlockSpec((bb, Lc_pad, D), lambda i: (i, 0, 0)),
            pl.BlockSpec((bb, 1, Lc_pad), lambda i: (i, 0, 0)),
            pl.BlockSpec((2, D), lambda i: (0, 0)),
            pl.BlockSpec((2, 1), lambda i: (0, 0)),
        ],
        out_specs=pl.BlockSpec((bb, 2, Lc_pad), lambda i: (i, 0, 0)),
        compiler_params=pltpu.CompilerParams(
            dimension_semantics=("parallel",),
            vmem_limit_bytes=vmem_limit),
        cost_estimate=cost,
    )(context_h, idx3, w, b2)

    return out[:B, 0, :Lc], out[:B, 1, :Lc]


def bert_gmv_forward(cw_idxs, qw_idxs, params):
    """Mirrors BertGMV.forward(cw_idxs, qw_idxs)."""
    # c_mask / q_mask are (ids != 0); the kernel re-derives c_mask from the raw
    # ids, so no separate float mask tensor is materialized in HBM.
    del qw_idxs  # question rows are sliced off by logits[:, Lq:, :] in the
                 # reference, so the question branch cannot affect the outputs.

    # TODO(synk): the frozen, pretrained 'bert-base-uncased' encoder cannot be
    # reproduced in-script; it is replaced by a deterministic bf16 embedding
    # table stand-in producing [B, L, 768] features (the module uses BERT under
    # torch.no_grad(), i.e. as a fixed feature extractor).
    B, Lc = cw_idxs.shape
    Lc_pad = _round_up(Lc, LANE)
    # Pre-pad the ids before the gather so the feature tensor lands in HBM
    # already lane-aligned (no extra pad copy of the big activation).
    cw_pad = jnp.pad(cw_idxs, ((0, 0), (0, Lc_pad - Lc)))
    context_output = jnp.take(params["emb"], cw_pad, axis=0)   # [B, Lc_pad, 768] bf16
    # TODO(synk): fusing this gather into the kernel (scalar-prefetch ids +
    # manual DMA row gather) would halve HBM traffic for this stand-in path; a
    # real BERT encoder would hand the features over in HBM anyway.

    start_p, end_p = qa_head(context_output, cw_pad, params["qa_w"], params["qa_b"])
    return start_p[:, :Lc], end_p[:, :Lc]


def _reference_forward(cw_idxs, qw_idxs, params):
    """Pure-jnp reference of the same math (for the correctness check)."""
    c_mask = (cw_idxs != 0)
    ctx = params["emb"][cw_idxs].astype(jnp.float32)
    qst = params["emb"][qw_idxs].astype(jnp.float32)
    w = params["qa_w"].astype(jnp.bfloat16).astype(jnp.float32)
    full = jnp.concatenate([qst, ctx], axis=1)                       # [B, Lq+Lc, D]
    logits = jnp.einsum("bld,od->blo", full, w,
                        precision=jax.lax.Precision.HIGHEST) + params["qa_b"]
    logits = logits[:, qst.shape[1]:, :]                             # [B, Lc, 2]
    start, end = logits[..., 0], logits[..., 1]

    def mls(x):
        x = jnp.where(c_mask, x, NEG_INF)
        return jax.nn.log_softmax(x, axis=-1)

    return mls(start), mls(end)


if __name__ == "__main__":
    key = jax.random.PRNGKey(0)
    k1, k2, k3, k4, k5 = jax.random.split(key, 5)

    B, Lq, Lc, V = 2, 8, 16, 128

    # Deterministic "parameters": bf16 embedding stand-in for the frozen BERT
    # features (bf16 storage halves the dominant HBM stream), plus
    # qa_outputs = nn.Linear(768, 2) weights.
    params = {
        "emb": (jax.random.normal(k1, (V, D_WORD), jnp.float32) * 0.02
                ).astype(jnp.bfloat16),
        "qa_w": jax.random.normal(k2, (2, D_WORD), jnp.float32) * 0.02,
        "qa_b": jax.random.normal(k3, (2,), jnp.float32) * 0.02,
    }

    # Token ids; 0 is the padding id (mask = ids != 0), add some padding tail.
    cw_idxs = jax.random.randint(k4, (B, Lc), 1, V)
    cw_idxs = cw_idxs.at[0, 12:].set(0).at[1, 10:].set(0)
    qw_idxs = jax.random.randint(k5, (B, Lq), 1, V)

    start_logits, end_logits = bert_gmv_forward(cw_idxs, qw_idxs, params)
    jax.block_until_ready((start_logits, end_logits))

    ref_start, ref_end = _reference_forward(cw_idxs, qw_idxs, params)
    assert start_logits.shape == (B, Lc) and end_logits.shape == (B, Lc)
    assert jnp.allclose(start_logits, ref_start, atol=1e-3, rtol=1e-3)
    assert jnp.allclose(end_logits, ref_end, atol=1e-3, rtol=1e-3)

    print("KERNEL_OK")
</pallas_src>

<mosaic_0001>
module attributes {stable_mosaic.version = 11 : i64} {
  func.func @qa_head_kernel(%arg0: i32, %arg1: memref<1x128x768xbf16, #tpu.memory_space<vmem>>, %arg2: memref<1x1x128xi32, #tpu.memory_space<vmem>>, %arg3: memref<2x768xbf16, #tpu.memory_space<vmem>>, %arg4: memref<2x1xf32, #tpu.memory_space<vmem>>, %arg5: memref<1x2x128xf32, #tpu.memory_space<vmem>>) attributes {dimension_semantics = [#tpu.dimension_semantics<parallel>], iteration_bounds = array<i64: 2>, scalar_prefetch = 0 : i64, scratch_operands = 0 : i64, tpu.core_type = #tpu.core_type<tc>, window_params = [{transform_indices = @transform_0, window_bounds = array<i64: 1, 128, 768>}, {transform_indices = @transform_1, window_bounds = array<i64: 1, 1, 128>}, {pipeline_mode = #tpu.pipeline_mode<synchronous>, transform_indices = @transform_2, window_bounds = array<i64: 2, 768>}, {pipeline_mode = #tpu.pipeline_mode<synchronous>, transform_indices = @transform_3, window_bounds = array<i64: 2, 1>}, {transform_indices = @transform_4, window_bounds = array<i64: 1, 2, 128>}]} {
    %c0 = arith.constant 0 : index
    %c0_0 = arith.constant 0 : index
    %0 = vector.load %arg3[%c0, %c0_0] : memref<2x768xbf16, #tpu.memory_space<vmem>>, vector<2x768xbf16>
    %1 = vector.shape_cast %0 : vector<2x768xbf16> to vector<1x2x768xbf16>
    %c0_1 = arith.constant 0 : index
    %c0_2 = arith.constant 0 : index
    %2 = vector.load %arg4[%c0_1, %c0_2] : memref<2x1xf32, #tpu.memory_space<vmem>>, vector<2x1xf32>
    %c0_i32 = arith.constant 0 : i32
    %c1_i32 = arith.constant 1 : i32
    %3 = arith.muli %c0_i32, %c1_i32 : i32
    %4 = arith.index_cast %3 : i32 to index
    %c0_3 = arith.constant 0 : index
    %c0_4 = arith.constant 0 : index
    %5 = vector.load %arg1[%4, %c0_3, %c0_4] : memref<1x128x768xbf16, #tpu.memory_space<vmem>>, vector<1x128x768xbf16>
    %6 = arith.index_cast %3 : i32 to index
    %c0_5 = arith.constant 0 : index
    %c0_6 = arith.constant 0 : index
    %7 = vector.load %arg2[%6, %c0_5, %c0_6] : memref<1x1x128xi32, #tpu.memory_space<vmem>>, vector<1x1x128xi32>
    "tpu.trace_start"() <{level = 10 : i32, message = "bod,bld->bol"}> : () -> ()
    %cst = arith.constant dense<0.000000e+00> : vector<1x2x128xf32>
    %8 = tpu.matmul %1, %5, %cst {dimension_numbers = #tpu.dot_dimension_numbers<[2], [2], [1], [1], [0, 0, 0, 1, 1, 1], [0], [0]>} : vector<1x2x768xbf16>, vector<1x128x768xbf16>, vector<1x2x128xf32> -> vector<1x2x128xf32>
    "tpu.trace_stop"() : () -> ()
    %9 = vector.shape_cast %2 : vector<2x1xf32> to vector<1x2x1xf32>
    %10 = vector.broadcast %9 : vector<1x2x1xf32> to vector<1x2x128xf32>
    %11 = arith.addf %8, %10 : vector<1x2x128xf32>
    %c0_i32_7 = arith.constant 0 : i32
    %12 = vector.broadcast %c0_i32_7 : i32 to vector<1x1x128xi32>
    %13 = arith.cmpi ne, %7, %12 : vector<1x1x128xi32>
    %cst_8 = arith.constant -1.000000e+30 : f32
    %14 = vector.shape_cast %13 : vector<1x1x128xi1> to vector<1x1x128xi1>
    %15 = vector.broadcast %14 : vector<1x1x128xi1> to vector<1x2x128xi1>
    %16 = vector.broadcast %cst_8 : f32 to vector<1x2x128xf32>
    %17 = arith.select %15, %11, %16 : vector<1x2x128xi1>, vector<1x2x128xf32>
    %cst_9 = arith.constant dense<0xFF800000> : vector<1x2xf32>
    %18 = vector.multi_reduction <maximumf>, %17, %cst_9 [2] : vector<1x2x128xf32> to vector<1x2xf32>
    %19 = vector.shape_cast %18 : vector<1x2xf32> to vector<1x2x1xf32>
    %20 = vector.broadcast %19 : vector<1x2x1xf32> to vector<1x2x128xf32>
    %21 = arith.subf %17, %20 : vector<1x2x128xf32>
    %22 = math.exp %21 : vector<1x2x128xf32>
    %cst_10 = arith.constant dense<0.000000e+00> : vector<1x2xf32>
    %23 = vector.multi_reduction <add>, %22, %cst_10 [2] : vector<1x2x128xf32> to vector<1x2xf32>
    %24 = vector.shape_cast %23 : vector<1x2xf32> to vector<1x2x1xf32>
    %25 = math.log %24 : vector<1x2x1xf32>
    %26 = arith.addf %25, %19 : vector<1x2x1xf32>
    %27 = vector.broadcast %26 : vector<1x2x1xf32> to vector<1x2x128xf32>
    %28 = arith.subf %17, %27 : vector<1x2x128xf32>
    %29 = arith.index_cast %3 : i32 to index
    %c0_11 = arith.constant 0 : index
    %c0_12 = arith.constant 0 : index
    %30 = vector.load %arg5[%29, %c0_11, %c0_12] : memref<1x2x128xf32, #tpu.memory_space<vmem>>, vector<1x2x128xf32>
    tpu.vector_store %arg5[%29, %c0_11, %c0_12], %28 {strides = array<i32>} : memref<1x2x128xf32, #tpu.memory_space<vmem>>, vector<1x2x128xf32>,
    %c1_i32_13 = arith.constant 1 : i32
    return
  }
  func.func @transform_0(%arg0: i32) -> (i32, i32, i32) {
    %c0_i32 = arith.constant 0 : i32
    %c0_i32_0 = arith.constant 0 : i32
    %c0_i32_1 = arith.constant 0 : i32
    return %arg0, %c0_i32, %c0_i32_0 : i32, i32, i32
  }
  func.func @transform_1(%arg0: i32) -> (i32, i32, i32) {
    %c0_i32 = arith.constant 0 : i32
    %c0_i32_0 = arith.constant 0 : i32
    %c0_i32_1 = arith.constant 0 : i32
    return %arg0, %c0_i32, %c0_i32_0 : i32, i32, i32
  }
  func.func @transform_2(%arg0: i32) -> (i32, i32) {
    %c0_i32 = arith.constant 0 : i32
    %c0_i32_0 = arith.constant 0 : i32
    %c0_i32_1 = arith.constant 0 : i32
    return %c0_i32, %c0_i32_0 : i32, i32
  }
  func.func @transform_3(%arg0: i32) -> (i32, i32) {
    %c0_i32 = arith.constant 0 : i32
    %c0_i32_0 = arith.constant 0 : i32
    %c0_i32_1 = arith.constant 0 : i32
    return %c0_i32, %c0_i32_0 : i32, i32
  }
  func.func @transform_4(%arg0: i32) -> (i32, i32, i32) {
    %c0_i32 = arith.constant 0 : i32
    %c0_i32_0 = arith.constant 0 : i32
    %c0_i32_1 = arith.constant 0 : i32
    return %arg0, %c0_i32, %c0_i32_0 : i32, i32, i32
  }
}

</mosaic_0001>

<bundles_post_ra>
// kernel: tpu_custom_call.1
= control target key start
LH: loop header
LB: loop body
LE: loop exit
PB: predicated region body
PF: predicated region fallthrough
CT: control target
= control target key end

     0   :  { %9 = vsyncpa [#allocation3], 0  ;;  %s1381_s0 = inlined_call_operand.hbm [shape: bf16[2,128,768], index: 0, kind: input, shape index: {}]   ;;  %s1382_s1 = inlined_call_operand.vmem [shape: s32[2,1,128], index: 1, kind: input, shape index: {}]   ;;  %s1383_s2 = inlined_call_operand.vmem [shape: bf16[2,768], index: 2, kind: input, shape index: {}]   ;;  %s1384_s3 = inlined_call_operand.vmem [shape: f32[2,1], index: 3, kind: input, shape index: {}]   ;;  %s1385_s4 = inlined_call_operand.hbm [shape: f32[2,2,128], index: 4, kind: output, shape index: {}]  }
   0x1   :  { %11 = vsyncpa [#allocation3 + $0x1], 0 }
   0x2   :  { %12 = vsyncpa [#allocation4], 0 }
   0x3   :  { %14 = vsyncpa [#allocation4 + $0x1], 0  ;;  %s1141_s15 = smov 0   ;;  %s1143_s16 = smov 0  }
   0x4   :  { %s1145_s17 = smov 0   ;;  %s1147_s18 = smov 0  }
   0x5 LB: > { %s1162_s19 = sadd.s32 4294967295, %s1108_s18   ;;  %s817_s20 = sadd.s32 4294967294, %s1108_s18   ;;  %s1108_s18 = sphi %s1147_s18, %s1397_s18   ;;  %s1104_s17 = sphi %s1145_s17, %s1396_s17   ;;  %s1100_s16 = sphi %s1143_s16, %s1395_s16   ;;  %s1096_s15 = sphi %s1141_s15, %s1394_s15  }
   0x6   : > { %s1166_s21 = sadd.s32 1, %s1108_s18   ;;  %s27_s22 = sadd.s32 1, %s1104_s17 }
   0x7   : > { %s24_s23 = ssub.s32 %s1108_s18, %s1166_s21  ;;  %p34_p0 = scmp.ne.s32.totalorder %s1104_s17, %s1100_s16 }
   0x8   : > { %p25_p1 = scmp.eq.s32.totalorder %s24_s23, 0  ;;  %p35_p2 = scmp.eq.s32.totalorder %s1108_s18, 0 }
   0x9   : > { %p40_p3 = scmp.ne.s32.totalorder %s1100_s16, %s1096_s15  ;;  %p41_p4 = scmp.eq.s32.totalorder %s1162_s19, 0 }
   0xa   : > { %s1178_s24 = scalar_select %p25_p1, %s1104_s17, %s27_s22  }
   0xb   : > { %p36_p5 = por %p35_p2, %p34_p0  ;;  %p1180_p6 = por %p41_p4, %p40_p3 }
   0xc   : > { %p132_p7 = scmp.eq.s32.totalorder %s1162_s19, 1  ;;  %p138_p8 = scmp.eq.s32.totalorder %s817_s20, 1 }
   0xd   : > { %p896_p10 = scmp.lt.s32.totalorder %s1108_s18, 2  ;;  %s164_s28 = sand.u32 1, %s1104_s17  }
   0xe   : > { %p1187_p11 = por %p132_p7, %p34_p0  ;;  %p1191_p12 = por %p138_p8, %p40_p3 }
   0xf   : > { %s882_s29 = smul.u32 6144, %s1108_s18  ;;  %p1202_p13 = pnand %p896_p10, %p36_p5 }
  0x10   : > { %s1388_s26 = scalar_select %p1187_p11, 1, 0 }
  0x11   : > { %s1389_s27 = scalar_select %p1191_p12, 1, 0 }
  0x12   : > { %s881_s30 = smul.u32 384, %s164_s28  ;;  %s1200_s7 = scalar_lea.hbm %s1381_s0, %s882_s29 }
  0x13   : > { %s1208_s11 = scalar_lea.sflag [#allocation3], %s164_s28  ;;  %s1012_s12 = scalar_lea.hbm %s1200_s7, 6144 }
  0x14   : > { %s168_s9 = scalar_lea.vmem [#allocation2], %s881_s30  ;;  %p1013_p0 = scmp.ne.s32.totalorder %s1200_s7, %s1012_s12 }
  0x15   : > { %s175_s10 = sshll.u32 %s168_s9, 4  ;;  %p1014_p1 = pneg %p1202_p13  ;;  %s1206_s10 = int_to_ptr.vmem [resolvable:$true] %s175_s10 }
  0x16   : > { %s1017_s20 = scalar_lea.hbm %s1381_s0, 12288  ;;  %p1018_p4 = scmp.lt.u32.totalorder %s1200_s7, %s1381_s0 }
  0x17   : > { %p1015_p2 = pnand %p1014_p1, %p1013_p0  ;;  %p1019_p5 = scmp.lt.u32.totalorder %s1017_s20, %s1012_s12 }
  0x18   : > { %p1021_p8 = scmp.lt.u32.totalorder %s1012_s12, %s1200_s7 }
  0x19   : > { %p1016_p3 = pneg %p1015_p2  ;;  %p1020_p7 = por %p1019_p5, %p1018_p4 }
  0x1b   : > { %p1022_p10 = por %p1021_p8, %p1020_p7 }
  0x1d   : > { %p1023_p9 = pnand %p1022_p10, %p1016_p3 }
  0x1f   : > { %1026 = shalt.err (!%p1023_p9)
}
  0x20   : > { %s1027_s28 = scalar_lea.vmem %s1206_s10, 6144  ;;  %s1110_s29 = smov [#allocation2]  }
  0x21   : > { %p1028_p0 = scmp.ne.s32.totalorder %s1206_s10, %s1027_s28  ;;  %s1032_s30 = sshll.u32 %s1110_s29, 4  ;;  %s1033_s30 = int_to_ptr.vmem [resolvable:$false] %s1032_s30 }
  0x22   : > { %s1034_s5 = scalar_lea.vmem %s1033_s30, 12288  ;;  %p1035_p11 = scmp.lt.s32.totalorder %s1206_s10, %s1033_s30 }
  0x23   : > { %p1030_p2 = pnand %p1028_p0, %p1014_p1  ;;  %p1036_p4 = scmp.lt.s32.totalorder %s1034_s5, %s1027_s28 }
  0x25   : > { %p1031_p12 = pneg %p1030_p2  ;;  %p1037_p5 = por %p1036_p4, %p1035_p11 }
  0x27   : > { %p1038_p7 = pnand %p1037_p5, %p1031_p12 }
  0x29   : > { %1041 = shalt.err (!%p1038_p7)
}
  0x2a   : > { %s1111_s6 = smov 384   ;;  %s1112_s9 = smov 24  }
  0x2b   : > { %891 = dma.hbm_to_vmem [thread:$0]  (!%p1202_p13), %s1200_s7, 6144, %s1206_s10, %s1208_s11, %s1111_s6, %s1111_s6, %s1112_s9  }
  0x2c   : > { %p821_p9 = scmp.ge.s32.totalorder %s1108_s18, 1  ;;  %p189_p1 = scmp.lt.s32.totalorder %s1108_s18, 3 }
  0x2e   : > { %p190_p3 = pnand %p821_p9, %p189_p1 }
  0x2f   : > { %s1239_s12 = sand.u32 (!%p190_p3), 1, %s1100_s16  }
  0x30   : > { %193 = sbr.rel (%p190_p3) target bundleno = 732 (0x2dc), region = 36  ;;  %s196_s14 = scalar_lea.sflag (!%p190_p3), [#allocation3], %s1239_s12 }
  0x31   : > { %s883_s13 = smul.u32 (!%p190_p3), 384, %s1239_s12 }
  0x33   : > { %s1243_s20 = scalar_lea.vmem (!%p190_p3), [#allocation2], %s883_s13 }
  0x37   : > { %1087 = dma.done.wait (%p1180_p6), %s196_s14, 6144  }
  0x38   : > { %1089 = vsyncadd (%p1180_p6), %s196_s14, 4294961152  ;;  %v935_v0 = vld [vmem:[%s1243_s20 + $0xc] ss:$24 sps:$4 sm:$0xff]   ;;  %v937_v1 = vld [vmem:[%s1243_s20 + $0x8] ss:$24 sps:$4 sm:$0xff]   ;;  %v292_v4 = vlaneseq  ;;  %v1114_v6 = vmov 0  }
  0x39   : > { %v1113_v2 = vmov 1966171168   ;;  %621 = vmatprep.subr.bf16.mxu0 %v935_v0  ;;  %v938_v5 = vld [vmem:[%s1243_s20 + $0x3c] ss:$24 sps:$4 sm:$0xff]   ;;  %934 = vset.pattern.permute.xlu0 %v1114_v6  ;;  %v940_v9 = vld [vmem:[%s1243_s20 + $0x38] ss:$24 sps:$4 sm:$0xff]  }
  0x3a   : > { %v290_v3 = vunpack.c.l.s4 %v1113_v2  ;;  %622 = vmatpush1.bf16.xpose.msra.mxu0 %v937_v1  ;;  %v293_v8 = vshrl.u32 %v292_v4, 7  ;;  %v941_v10 = vld [vmem:[%s1243_s20 + $0x6c] ss:$24 sps:$4 sm:$0xff]   ;;  %v961_v13 = vld [vmem:[%s1243_s20] ss:$24 sps:$4 sm:$0xff]   ;;  %p227_p6 = scmp.lt.s32.totalorder %s1162_s19, 1 }
  0x3b   : > { %623 = vmatprep.subr.bf16.mxu0 %v938_v5  ;;  %v959_v12 = vld [vmem:[%s1243_s20 + $0x4] ss:$24 sps:$4 sm:$0xff]   ;;  %v966_v17 = vld [vmem:[%s1243_s20 + $0x34] ss:$24 sps:$4 sm:$0xff]   ;;  %v943_v18 = vld [vmem:[%s1243_s20 + $0x68] ss:$24 sps:$4 sm:$0xff]  }
  0x3c   : > { %v291_v7 = vunpack.c.0.s8 %v290_v3  ;;  %v231_v14 = vld [vmem:[%s1383_s2] sm:$0x3f]  ;;  %581 = vmatprep.subr.bf16.mxu1 %v959_v12  ;;  %v944_v21 = vld [vmem:[%s1243_s20 + $0x9c] ss:$24 sps:$4 sm:$0xff]   ;;  %v968_v24 = vld [vmem:[%s1243_s20 + $0x30] ss:$24 sps:$4 sm:$0xff]  }
  0x3d   : > { %v288_v15 = vcombine.high %v231_v14, %v231_v14  ;;  %582 = vmatpush1.bf16.xpose.msra.mxu1 %v961_v13  ;;  %v972_v26 = vld [vmem:[%s1243_s20 + $0x64] ss:$24 sps:$4 sm:$0xff]   ;;  %v946_v27 = vld [vmem:[%s1243_s20 + $0x98] ss:$24 sps:$4 sm:$0xff]   ;;  %s228_s8 = scalar_select %p227_p6, %s1162_s19, 1  ;;  %v705_v32 = vsub.s32 0, %v293_v8 }
  0x3e   : > { %v1254_v11 = vsub.s32 %v291_v7, %v293_v8  ;;  %583 = vmatprep.subr.bf16.mxu1 %v966_v17  ;;  %v947_v28 = vld [vmem:[%s1243_s20 + $0xcc] ss:$24 sps:$4 sm:$0xff]   ;;  %v974_v29 = vld [vmem:[%s1243_s20 + $0x60] ss:$24 sps:$4 sm:$0xff]   ;;  %v950_v33 = vld [vmem:[%s1243_s20 + $0xfc] ss:$24 sps:$4 sm:$0xff]  }
  0x3f   : > { %v978_v30 = vld [vmem:[%s1243_s20 + $0x94] ss:$24 sps:$4 sm:$0xff]   ;;  %s229_s22 = scalar_lea.vmem %s1382_s1, %s228_s8  ;;  %v949_v31 = vld [vmem:[%s1243_s20 + $0xc8] ss:$24 sps:$4 sm:$0xff]   ;;  %v984_v38 = vld [vmem:[%s1243_s20 + $0xc4] ss:$24 sps:$4 sm:$0xff]  }
  0x40   : > { %v1262_v16 = vrot.slane %v231_v14, %v1254_v11  ;;  %v1269_v20 = vrot.slane %v288_v15, %v1254_v11  ;;  %v281_v34 = vld [vmem:[%s229_s22] sm:$0x1]  ;;  %v980_v36 = vld [vmem:[%s1243_s20 + $0x90] ss:$24 sps:$4 sm:$0xff]   ;;  %v953_v41 = vld [vmem:[%s1243_s20 + $0x12c] ss:$24 sps:$4 sm:$0xff]  }
  0x41   : > { %v232_v35 = vld [vmem:[%s1384_s3] sm:$0x3]  ;;  %vm701_vm0 = vcmp.ne.s32.totalorder %v281_v34, 0  ;;  %v952_v40 = vld [vmem:[%s1243_s20 + $0xf8] ss:$24 sps:$4 sm:$0xff]   ;;  %vm709_vm2 = vcmask 1041408  }
  0x42   : > { %624 = vmatpush1.bf16.xpose.msra.mxu0 %v940_v9  ;;  %v303_v19 = vcombine.high %v1262_v16, %v1262_v16  ;;  %v318_v23 = vrot.slane %v1269_v20, %v1254_v11  ;;  %284 = vperm.xlu0 %934, %v232_v35   ;;  %v702_v37 = vsel %vm701_vm0, 1, %v1114_v6  ;;  %v986_v42 = vld [vmem:[%s1243_s20 + $0xc0] ss:$24 sps:$4 sm:$0xff]   ;;  %v990_v43 = vld [vmem:[%s1243_s20 + $0xf4] ss:$24 sps:$4 sm:$0xff]   ;;  %v311_v50 = vrot.slane %v1262_v16, %v1254_v11  ;;  %s822_s29 = sshll.u32 %s1239_s12, 1 }
  0x43   : > { %625 = vmatprep.subr.bf16.mxu0 %v941_v10  ;;  %v1293_v39 = vrot.slane %v702_v37, %v705_v32  ;;  %v955_v44 = vld [vmem:[%s1243_s20 + $0x128] ss:$24 sps:$4 sm:$0xff]   ;;  %v956_v45 = vld [vmem:[%s1243_s20 + $0x15c] ss:$24 sps:$4 sm:$0xff]   ;;  %v958_v48 = vld [vmem:[%s1243_s20 + $0x158] ss:$24 sps:$4 sm:$0xff]   ;;  %v304_v53 = vcombine.high %v1269_v20, %v1269_v20 }
  0x44   : > { %v325_v22 = vrot.slane %v303_v19, %v1254_v11  ;;  %v992_v46 = vld [vmem:[%s1243_s20 + $0xf0] ss:$24 sps:$4 sm:$0xff]   ;;  %v996_v47 = vld [vmem:[%s1243_s20 + $0x124] ss:$24 sps:$4 sm:$0xff]   ;;  %v965_v49 = vld [vmem:[%s1243_s20 + $0x14] ss:$24 sps:$4 sm:$0xff]   ;;  %v333_v54 = vcombine.high %v311_v50, %v311_v50 }
  0x45   : > { %584 = vmatpush1.bf16.xpose.msra.mxu1 %v968_v24  ;;  %v998_v51 = vld [vmem:[%s1243_s20 + $0x120] ss:$24 sps:$4 sm:$0xff]   ;;  %v1002_v52 = vld [vmem:[%s1243_s20 + $0x154] ss:$24 sps:$4 sm:$0xff]   ;;  %v963_v55 = vld [vmem:[%s1243_s20 + $0x10] ss:$24 sps:$4 sm:$0xff]   ;;  %v332_v56 = vrot.slane %v304_v53, %v1254_v11 }
  0x46   : > { %v334_v25 = vcombine.high %v325_v22, %v325_v22  ;;  %613 = vmatprep.mubr.bf16.mxu1 %v325_v22  ;;  %585 = vmatprep.subr.bf16.mxu1 %v972_v26  ;;  %v971_v57 = vld [vmem:[%s1243_s20 + $0x44] ss:$24 sps:$4 sm:$0xff]   ;;  %v1004_v58 = vld [vmem:[%s1243_s20 + $0x150] ss:$24 sps:$4 sm:$0xff]   ;;  %v969_v59 = vld [vmem:[%s1243_s20 + $0x40] ss:$24 sps:$4 sm:$0xff]  }
  0x47   : > { %v977_v60 = vld [vmem:[%s1243_s20 + $0x74] ss:$24 sps:$4 sm:$0xff]   ;;  %v975_v61 = vld [vmem:[%s1243_s20 + $0x70] ss:$24 sps:$4 sm:$0xff]   ;;  %v983_v62 = vld [vmem:[%s1243_s20 + $0xa4] ss:$24 sps:$4 sm:$0xff]  }
  0x48   : > { %653 = vmatprep.mubr.bf16.mxu0 %v334_v25  ;;  %v981_v63 = vld [vmem:[%s1243_s20 + $0xa0] ss:$24 sps:$4 sm:$0xff]   ;;  %v989_v0 = vld [vmem:[%s1243_s20 + $0xd4] ss:$24 sps:$4 sm:$0xff]   ;;  %v987_v1 = vld [vmem:[%s1243_s20 + $0xd0] ss:$24 sps:$4 sm:$0xff]  }
  0x49   : > { %v995_v2 = vld [vmem:[%s1243_s20 + $0x104] ss:$24 sps:$4 sm:$0xff]   ;;  %v993_v3 = vld [vmem:[%s1243_s20 + $0x100] ss:$24 sps:$4 sm:$0xff]   ;;  %v1001_v4 = vld [vmem:[%s1243_s20 + $0x134] ss:$24 sps:$4 sm:$0xff]  }
  0x4a   : > { %626 = vmatpush1.bf16.xpose.msra.mxu0 %v943_v18  ;;  %v999_v5 = vld [vmem:[%s1243_s20 + $0x130] ss:$24 sps:$4 sm:$0xff]   ;;  %v1007_v6 = vld [vmem:[%s1243_s20 + $0x164] ss:$24 sps:$4 sm:$0xff]   ;;  %v1005_v7 = vld [vmem:[%s1243_s20 + $0x160] ss:$24 sps:$4 sm:$0xff]  }
  0x4b   : > { %627 = vmatprep.subr.bf16.mxu0 %v944_v21  ;;  %vm707_vm1 = vcmp.eq.s32.totalorder %v1293_v39, 1  ;;  %s872_s30 = sshll.u32 %s1162_s19, 5  ;;  %s226_s5 = scalar_lea.vmem [#allocation5], %s822_s29 }
  0x4c   : > { %s738_s6 = sshll.u32 %s226_s5, 4  ;;  %s1337_s14 = scalar_lea.hbm %s1385_s4, %s872_s30  ;;  %s1339_s6 = int_to_ptr.vmem [resolvable:$true] %s738_s6 }
  0x4d   : > { %586 = vmatpush1.bf16.xpose.msra.mxu1 %v974_v29  ;;  %s725_s20 = scalar_lea.sflag [#allocation4], %s1239_s12  ;;  %s1042_s25 = scalar_lea.vmem %s1339_s6, 32 }
  0x4e   : > { %587 = vmatprep.subr.bf16.mxu1 %v978_v30  ;;  %p1043_p11 = scmp.ne.s32.totalorder %s1339_s6, %s1042_s25  ;;  %p1391_p12 = scmp.ne.s32.totalorder %s1388_s26, 0 }
  0x4f   : > { %s1115_s19 = smov [#allocation5]  }
  0x50   : > { %p1044_p13 = pnand %p1043_p11, %p1391_p12  ;;  %s1046_s7 = sshll.u32 %s1115_s19, 4  ;;  %s1047_s7 = int_to_ptr.vmem [resolvable:$false] %s1046_s7 }
  0x51   : > { %s1048_s8 = scalar_lea.vmem %s1047_s7, 64  ;;  %p1049_p10 = scmp.lt.s32.totalorder %s1339_s6, %s1047_s7 }
  0x52   : > { %628 = vmatpush1.bf16.xpose.msra.mxu0 %v946_v27  ;;  %p1045_p8 = pneg %p1044_p13  ;;  %p1050_p0 = scmp.lt.s32.totalorder %s1048_s8, %s1042_s25 }
  0x53   : > { %629 = vmatprep.subr.bf16.mxu0 %v947_v28 }
  0x54   : > { %p1051_p2 = por %p1050_p0, %p1049_p10 }
  0x55   : > { %588 = vmatpush1.bf16.xpose.msra.mxu1 %v980_v36 }
  0x56   : > { %589 = vmatprep.subr.bf16.mxu1 %v984_v38  ;;  %p1052_p4 = pnand %p1051_p2, %p1045_p8 }
  0x5a   : > { %630 = vmatpush1.bf16.xpose.msra.mxu0 %v949_v31 }
  0x5b   : > { %631 = vmatprep.subr.bf16.mxu0 %v950_v33 }
  0x5d   : > { %590 = vmatpush1.bf16.xpose.msra.mxu1 %v986_v42 }
  0x5e   : > { %591 = vmatprep.subr.bf16.mxu1 %v990_v43 }
  0x62   : > { %632 = vmatpush1.bf16.xpose.msra.mxu0 %v952_v40 }
  0x63   : > { %633 = vmatprep.subr.bf16.mxu0 %v953_v41 }
  0x65   : > { %592 = vmatpush1.bf16.xpose.msra.mxu1 %v992_v46 }
  0x66   : > { %593 = vmatprep.subr.bf16.mxu1 %v996_v47 }
  0x6a   : > { %634 = vmatpush1.bf16.xpose.msra.mxu0 %v955_v44 }
  0x6b   : > { %635 = vmatprep.subr.bf16.mxu0 %v956_v45 }
  0x6d   : > { %594 = vmatpush1.bf16.xpose.msra.mxu1 %v998_v51 }
  0x6e   : > { %595 = vmatprep.subr.bf16.mxu1 %v1002_v52 }
  0x72   : > { %636 = vmatpush1.bf16.xpose.msra.mxu0 %v958_v48 }
  0x73   : > { %661 = vmatprep.subr.bf16.mxu0 %v965_v49 }
  0x75   : > { %596 = vmatpush1.bf16.xpose.msra.mxu1 %v1004_v58 }
  0x79   : > { %654 = vmatmul.mubr.bf16.vlgmr.msra.gmra.mrb[0].mxu0 %v333_v54 }
  0x7a   : > { %662 = vmatpush1.bf16.xpose.msra.mxu0 %v963_v55  ;;  %693 = vmatprep.mubr.bf16.mxu0 %v332_v56 }
  0x7b   : > { %663 = vmatprep.subr.bf16.mxu0 %v971_v57 }
  0x7c   : > { %614 = vmatmul.mubr.bf16.vlgmr.msra.gmra.mrb[0].mxu1 %v311_v50 }
  0x82   : > { %664 = vmatpush1.bf16.xpose.msra.mxu0 %v969_v59 }
  0x83   : > { %665 = vmatprep.subr.bf16.mxu0 %v977_v60 }
  0x8a   : > { %666 = vmatpush1.bf16.xpose.msra.mxu0 %v975_v61 }
  0x8b   : > { %667 = vmatprep.subr.bf16.mxu0 %v983_v62 }
  0x92   : > { %668 = vmatpush1.bf16.xpose.msra.mxu0 %v981_v63 }
  0x93   : > { %669 = vmatprep.subr.bf16.mxu0 %v989_v0 }
  0x9a   : > { %670 = vmatpush1.bf16.xpose.msra.mxu0 %v987_v1 }
  0x9b   : > { %671 = vmatprep.subr.bf16.mxu0 %v995_v2 }
  0xa2   : > { %672 = vmatpush1.bf16.xpose.msra.mxu0 %v993_v3 }
  0xa3   : > { %673 = vmatprep.subr.bf16.mxu0 %v1001_v4 }
  0xaa   : > { %674 = vmatpush1.bf16.xpose.msra.mxu0 %v999_v5 }
  0xab   : > { %675 = vmatprep.subr.bf16.mxu0 %v1007_v6 }
  0xb2   : > { %676 = vmatpush1.bf16.xpose.msra.mxu0 %v1005_v7 }
  0xb9   : > { %694 = vmatmul.mubr.bf16.vlgmr.msra.gmra.mrb[0].mxu0 %v318_v23 }
  0xc1   : > { %v285_v13 = vpop.permute.xlu0 %284 }
 0x14f   : > { %v615_v8 = vpop.f32.mrb[0].mxu1 }
 0x150   : > { %v617_v9 = vpop.f32.mrb[1].mxu1  ;;  %v616_v14 = vadd.f32 %v615_v8, %v285_v13 }
 0x151   : > { %v618_v10 = vpop.f32.mrb[2].mxu1 }
 0x152   : > { %v619_v12 = vpop.f32.mrb[3].mxu1 }
 0x18c   : > { %v695_v15 = vpop.f32.mrb[0].mxu0 }
 0x18d   : > { %v876_v16 = vadd.f32 %v695_v15, %v616_v14  ;;  %v697_v17 = vpop.f32.mrb[1].mxu0 }
 0x18e   : > { %v698_v18 = vpop.f32.mrb[2].mxu0 }
 0x18f   : > { %v708_v19 = vsel %vm707_vm1, %v876_v16, -1e+30  ;;  %v699_v21 = vpop.f32.mrb[3].mxu0 }
 0x190   : > { %v710_v22 = vsel %vm709_vm2, %v708_v19, -inf }
 0x191   : > { %711 = vmax.xlane.f32.xlu0 %v710_v22 }
 0x21e   : > { %v712_v11 = vpop.xlane.xlu0 %711 }
 0x21f   : > { %v713_v20 = vsub.f32 %v708_v19, %v712_v11 }
 0x221   : > { %v714_v23 = vmul.f32 1.442695, %v713_v20 }
 0x223   : > { %1008 = vpow2.f32 %v714_v23 }
 0x22d   : > { %v1009_v24 = vpop.eup %1008 }
 0x22e   : > { %v716_v25 = vsel %vm709_vm2, %v1009_v24, 0.0 }
 0x22f   : > { %717 = vadd.xlane.f32.xlu1 %v716_v25 }
 0x2bc   : > { %v718_v26 = vpop.xlane.xlu1 %717 }
 0x2bd   : > { %1010 = vlog2.f32 %v718_v26 }
 0x2c7   : > { %v1011_v27 = vpop.eup %1010 }
 0x2c8   : > { %v720_v28 = vmul.f32 0.6931472, %v1011_v27 }
 0x2ca   : > { %v721_v29 = vadd.f32 %v720_v28, %v712_v11 }
 0x2cc   : > { %v722_v30 = vsub.f32 %v708_v19, %v721_v29 }
 0x2ce   : > { %723 = vst [vmem:[%s226_s5] sm:$0x3] %v722_v30 }
 0x2cf   : > { %1055 = shalt.err (!%p1052_p4)
}
 0x2d0   : > { %s1056_s12 = scalar_lea.hbm %s1337_s14, 32  ;;  %s1060_s22 = scalar_lea.hbm %s1385_s4, 64 }
 0x2d1   : > { %p1057_p5 = scmp.ne.s32.totalorder %s1337_s14, %s1056_s12  ;;  %p1061_p1 = scmp.lt.u32.totalorder %s1337_s14, %s1385_s4 }
 0x2d2   : > { %p1062_p3 = scmp.lt.u32.totalorder %s1060_s22, %s1056_s12  ;;  %p1064_p11 = scmp.lt.u32.totalorder %s1056_s12, %s1337_s14 }
 0x2d3   : > { %p1058_p7 = pnand %p1057_p5, %p1391_p12 }
 0x2d4   : > { %p1063_p6 = por %p1062_p3, %p1061_p1 }
 0x2d5   : > { %p1059_p9 = pneg %p1058_p7 }
 0x2d6   : > { %p1065_p13 = por %p1064_p11, %p1063_p6 }
 0x2d8   : > { %p1066_p8 = pnand %p1065_p13, %p1059_p9 }
 0x2da   : > { %1069 = shalt.err (!%p1066_p8)
}
 0x2db   : > { %886 = dma.vmem_to_hbm [thread:$0]  (%p1391_p12), %s1339_s6, 32, %s1337_s14, %s725_s20  }
 0x2dc PF: > { %s750_s29 = sand.u32 1, %s1096_s15   ;;  %p1392_p10 = scmp.ne.s32.totalorder %s1389_s27, 0 }
 0x2dd   : > { %p1393_p0 = scmp.ge.s32.totalorder %s1108_s18, 2  ;;  %s751_s30 = scalar_lea.sflag [#allocation4], %s750_s29 }
 0x2df   : > { %p893_p2 = pnand %p1393_p0, %p1392_p10 }
 0x2e1   : > { %1091 = dma.done.wait (!%p893_p2), %s751_s30, 32  }
 0x2e2   : > { %1093 = vsyncadd (!%p893_p2), %s751_s30, 4294967264  ;;  %p17_p4 = scmp.ge.s32.totalorder %s1166_s21, 4   ;;  %s1394_s15 = smov %s1100_s16 }
 0x2e3   : > { %s1395_s16 = smov %s1104_s17  ;;  %s1396_s17 = smov %s1178_s24 }
 0x2e4   : > { %s1397_s18 = smov %s1166_s21  ;;  %19 = sbr.rel (!%p17_p4) target bundleno = 5 (0x5), region = 84 }
 0x2eb   :  { %756 = vsyncpa [#allocation3], 1 }
 0x2ec   :  { %758 = vsyncpa [#allocation3 + $0x1], 1 }
 0x2ed   :  { %759 = vsyncpa [#allocation4], 1 }
 0x2ee   :  { %761 = vsyncpa [#allocation4 + $0x1], 1 }

</bundles_post_ra>
